<compile_context>
chip_gen: v7x
topology: tpu7x:2x2x1
jax: 0.10.0
libtpu: 0.0.40
codegen_flags: <defaults>
</compile_context>

<pallas_src>
import jax
import jax.numpy as jnp
from jax.experimental import pallas as pl
from jax.experimental.pallas import tpu as pltpu

COUT = 7             # output channels of both convs
KHW = 4              # 2x2 kernel / patch
P = COUT * KHW       # 28 logical patch columns
LANES = 128          # lane-padded column count (unmasked vst, full MXU width)


def _fused_kernel(x_ref, wt_ref, bt_ref, c_ref, b2_ref, o_ref):
    # ConvTranspose2d(480->7, k=2, s=2) on a 1x1 input == one matmul into the
    # lane-padded patch layout.  x is cast to the weight dtype (bf16 default)
    # inside the kernel: HBM read stays f32, only the MXU pass count drops.
    x = x_ref[...].astype(wt_ref.dtype)
    x5 = jnp.dot(x, wt_ref[...], preferred_element_type=jnp.float32) + bt_ref[...]
    # torch.where(x2 > 0, x2, 0.5 * x2); zero-padded lanes stay exactly zero.
    x5 = jnp.where(x5 > 0.0, x5, x5 * 0.5)
    # residual + avg-pool broadcast + Conv2d(7->7,2,s=2) broadcast, folded into
    # one (128,128) f32 matrix C and one folded bias row.
    o_ref[...] = jnp.dot(x5, c_ref[...],
                         preferred_element_type=jnp.float32) + b2_ref[...]


def fold_params(wt, bt, w2, b2, *, mxu_bf16=True):
    """Fold deconv + pool + conv + residual into matmul form.

    Call ONCE per weight set (outside the per-step serving path) so the tiny
    XLA glue here is not rebuilt per forward call.
    """
    k = wt.shape[0]
    # deconv weight (cin, cout, kh, kw) -> (cin, o*4+kh*2+kw)
    wt_mat = wt.reshape(k, P).astype(jnp.float32)                         # (480, 28)
    bt28 = jnp.repeat(bt.astype(jnp.float32), KHW)[None, :]               # (1, 28)
    # avg-pool over the 2x2 patch + broadcast back, per output channel
    q = jnp.kron(jnp.eye(COUT, dtype=jnp.float32),
                 jnp.full((KHW, KHW), 1.0 / KHW, jnp.float32))            # (28, 28)
    # conv weight (o, c, kh, kw) -> (c*4 + kh*2 + kw, o)
    w2_mat = jnp.transpose(w2.astype(jnp.float32),
                           (1, 2, 3, 0)).reshape(P, COUT)                 # (28, 7)
    bcast = jnp.kron(jnp.eye(COUT, dtype=jnp.float32),
                     jnp.ones((1, KHW), dtype=jnp.float32))               # (7, 28)
    # out = x5 + x5 @ q + (x5 @ w2_mat + b2) @ bcast
    c_mat = jnp.eye(P, dtype=jnp.float32) + q + w2_mat @ bcast            # (28, 28)
    b2b = b2.astype(jnp.float32)[None, :] @ bcast                         # (1, 28)

    # lane-pad 28 -> 128 with zeros (padded columns stay 0 through leaky-relu)
    wt_p = jnp.pad(wt_mat, ((0, 0), (0, LANES - P)))                      # (480, 128)
    bt_p = jnp.pad(bt28, ((0, 0), (0, LANES - P)))                        # (1, 128)
    c_p = jnp.pad(c_mat, ((0, LANES - P), (0, LANES - P)))                # (128, 128)
    b2_p = jnp.pad(b2b, ((0, 0), (0, LANES - P)))                         # (1, 128)
    if mxu_bf16:
        # only the deep (K=480) matmul operand goes bf16; accumulation is f32.
        wt_p = wt_p.astype(jnp.bfloat16)
    return (wt_p, bt_p, c_p, b2_p)


def _pick_tm(m8, tm_target=2048):
    """Row-tile size: one full block for small batches; otherwise ~2048-row
    tiles with an EVEN number of grid steps (keeps both v7x TCs busy)."""
    if m8 <= tm_target:
        return m8
    steps = 2 * (-(-m8 // (2 * tm_target)))      # even step count
    tm = -(-m8 // steps)
    return ((tm + 7) // 8) * 8                   # sublane-aligned


@jax.jit
def model_forward(x, folded):
    """x: (N, 480, 1, 1) NCHW f32.  Returns (N, 7, 2, 2) NCHW f32."""
    wt_p, bt_p, c_p, b2_p = folded
    n, cin, h, w = x.shape
    assert (h, w) == (1, 1), "module's final add only broadcasts for 1x1 input"

    xm = x.reshape(n, cin)
    m8 = ((n + 7) // 8) * 8
    if m8 != n:                                   # pad at most 7 rows
        xm = jnp.pad(xm, ((0, m8 - n), (0, 0)))

    tm = _pick_tm(m8)
    grid = pl.cdiv(m8, tm)                        # partial last block: OOB rows
                                                  # read junk, stores masked; no
                                                  # cross-row reduction -> safe.
    out = pl.pallas_call(
        _fused_kernel,
        out_shape=jax.ShapeDtypeStruct((m8, LANES), jnp.float32),
        grid=(grid,),
        in_specs=[
            pl.BlockSpec((tm, cin), lambda i: (i, 0)),     # x rows (pipelined)
            # grid-invariant operands below are DMA'd once (constant index_map);
            # their ~0.6 MB of extra double-buffering is negligible here.
            pl.BlockSpec((cin, LANES), lambda i: (0, 0)),  # deconv weight
            pl.BlockSpec((1, LANES), lambda i: (0, 0)),    # deconv bias
            pl.BlockSpec((LANES, LANES), lambda i: (0, 0)),  # folded C
            pl.BlockSpec((1, LANES), lambda i: (0, 0)),    # folded conv bias
        ],
        out_specs=pl.BlockSpec((tm, LANES), lambda i: (i, 0)),
        compiler_params=pltpu.CompilerParams(
            dimension_semantics=("parallel",),
            vmem_limit_bytes=32 * 1024 * 1024),
    )(xm, wt_p, bt_p, c_p, b2_p)

    # drop padded rows / lanes, back to NCHW (n, 7, 2, 2)
    return out[:n, :P].reshape(n, COUT, 2, 2)


def _reference(x, wt, bt, w2, b2):
    """Pure-JAX f32 reference with the original module semantics (1x1 input)."""
    x2 = jnp.einsum('nc,cokl->nokl', x[:, :, 0, 0], wt) + bt[None, :, None, None]
    x5 = jnp.where(x2 > 0, x2, 0.5 * x2)
    pool = jnp.mean(x5, axis=(2, 3), keepdims=True)
    conv = (jnp.einsum('nckl,ockl->no', x5, w2)[:, :, None, None]
            + b2[None, :, None, None])
    return x5 + pool + conv


if __name__ == "__main__":
    key = jax.random.PRNGKey(0)
    kx, k1, k2, k3, k4, kx2 = jax.random.split(key, 6)

    N, CIN = 2, 480
    x = jax.random.normal(kx, (N, CIN, 1, 1), dtype=jnp.float32)

    # deterministic parameter init (PyTorch-style uniform ranges)
    bound = 1.0 / (COUT * 2 * 2) ** 0.5
    wt = jax.random.uniform(k1, (CIN, COUT, 2, 2), jnp.float32, -bound, bound)
    bt = jax.random.uniform(k2, (COUT,), jnp.float32, -bound, bound)
    w2 = jax.random.uniform(k3, (COUT, COUT, 2, 2), jnp.float32, -bound, bound)
    b2 = jax.random.uniform(k4, (COUT,), jnp.float32, -bound, bound)

    ref = _reference(x, wt, bt, w2, b2)

    # exact path (f32 MXU): proves the folding/kernel algebra to 1e-4
    folded_f32 = fold_params(wt, bt, w2, b2, mxu_bf16=False)
    y = jax.block_until_ready(model_forward(x, folded_f32))
    assert y.shape == (N, COUT, 2, 2)
    assert jnp.allclose(y, ref, atol=1e-4, rtol=1e-4), \
        float(jnp.max(jnp.abs(y - ref)))

    # default fast path: bf16 first matmul (f32 accumulation), f32 second matmul
    folded = fold_params(wt, bt, w2, b2, mxu_bf16=True)
    yf = jax.block_until_ready(model_forward(x, folded))
    assert jnp.allclose(yf, ref, atol=1e-1, rtol=1e-1), \
        float(jnp.max(jnp.abs(yf - ref)))

    # larger batch: exercises the multi-step even grid and the partial
    # (masked) tail block with no wrapper-side tm padding
    N2 = 2500
    xb = jax.random.normal(kx2, (N2, CIN, 1, 1), dtype=jnp.float32)
    refb = _reference(xb, wt, bt, w2, b2)
    yb = jax.block_until_ready(model_forward(xb, folded))
    assert yb.shape == (N2, COUT, 2, 2)
    assert jnp.allclose(yb, refb, atol=1e-1, rtol=1e-1), \
        float(jnp.max(jnp.abs(yb - refb)))
    yb_f32 = jax.block_until_ready(model_forward(xb, folded_f32))
    assert jnp.allclose(yb_f32, refb, atol=1e-4, rtol=1e-4), \
        float(jnp.max(jnp.abs(yb_f32 - refb)))

    print("KERNEL_OK")
</pallas_src>

<mosaic_0001>
module attributes {stable_mosaic.version = 11 : i64} {
  func.func @_fused_kernel(%arg0: i32, %arg1: memref<8x480xf32, #tpu.memory_space<vmem>>, %arg2: memref<480x128xf32, #tpu.memory_space<vmem>>, %arg3: memref<1x128xf32, #tpu.memory_space<vmem>>, %arg4: memref<128x128xf32, #tpu.memory_space<vmem>>, %arg5: memref<1x128xf32, #tpu.memory_space<vmem>>, %arg6: memref<8x128xf32, #tpu.memory_space<vmem>>) attributes {dimension_semantics = [#tpu.dimension_semantics<parallel>], iteration_bounds = array<i64: 1>, scalar_prefetch = 0 : i64, scratch_operands = 0 : i64, tpu.core_type = #tpu.core_type<tc>, window_params = [{transform_indices = @transform_0, window_bounds = array<i64: 8, 480>}, {pipeline_mode = #tpu.pipeline_mode<synchronous>, transform_indices = @transform_1, window_bounds = array<i64: 480, 128>}, {pipeline_mode = #tpu.pipeline_mode<synchronous>, transform_indices = @transform_2, window_bounds = array<i64: 1, 128>}, {pipeline_mode = #tpu.pipeline_mode<synchronous>, transform_indices = @transform_3, window_bounds = array<i64: 128, 128>}, {pipeline_mode = #tpu.pipeline_mode<synchronous>, transform_indices = @transform_4, window_bounds = array<i64: 1, 128>}, {transform_indices = @transform_5, window_bounds = array<i64: 8, 128>}]} {
    %c0 = arith.constant 0 : index
    %c0_0 = arith.constant 0 : index
    %0 = vector.load %arg1[%c0, %c0_0] : memref<8x480xf32, #tpu.memory_space<vmem>>, vector<8x480xf32>
    %c0_1 = arith.constant 0 : index
    %c0_2 = arith.constant 0 : index
    %1 = vector.load %arg2[%c0_1, %c0_2] : memref<480x128xf32, #tpu.memory_space<vmem>>, vector<480x128xf32>
    %cst = arith.constant dense<0.000000e+00> : vector<8x128xf32>
    %2 = tpu.matmul %0, %1, %cst {dimension_numbers = #tpu.dot_dimension_numbers<[1], [0], [0], [1], [0, 0, 1, 1], [], []>} : vector<8x480xf32>, vector<480x128xf32>, vector<8x128xf32> -> vector<8x128xf32>
    %c0_3 = arith.constant 0 : index
    %c0_4 = arith.constant 0 : index
    %3 = vector.load %arg3[%c0_3, %c0_4] : memref<1x128xf32, #tpu.memory_space<vmem>>, vector<1x128xf32>
    %4 = vector.broadcast %3 : vector<1x128xf32> to vector<8x128xf32>
    %5 = arith.addf %2, %4 : vector<8x128xf32>
    %cst_5 = arith.constant 0.000000e+00 : f32
    %6 = vector.broadcast %cst_5 : f32 to vector<8x128xf32>
    %7 = arith.cmpf ogt, %5, %6 : vector<8x128xf32>
    %cst_6 = arith.constant 5.000000e-01 : f32
    %8 = vector.broadcast %cst_6 : f32 to vector<8x128xf32>
    %9 = arith.mulf %5, %8 : vector<8x128xf32>
    %10 = arith.select %7, %5, %9 : vector<8x128xi1>, vector<8x128xf32>
    %c0_7 = arith.constant 0 : index
    %c0_8 = arith.constant 0 : index
    %11 = vector.load %arg4[%c0_7, %c0_8] : memref<128x128xf32, #tpu.memory_space<vmem>>, vector<128x128xf32>
    %cst_9 = arith.constant dense<0.000000e+00> : vector<8x128xf32>
    %12 = tpu.matmul %10, %11, %cst_9 {dimension_numbers = #tpu.dot_dimension_numbers<[1], [0], [0], [1], [0, 0, 1, 1], [], []>} : vector<8x128xf32>, vector<128x128xf32>, vector<8x128xf32> -> vector<8x128xf32>
    %c0_10 = arith.constant 0 : index
    %c0_11 = arith.constant 0 : index
    %13 = vector.load %arg5[%c0_10, %c0_11] : memref<1x128xf32, #tpu.memory_space<vmem>>, vector<1x128xf32>
    %14 = vector.broadcast %13 : vector<1x128xf32> to vector<8x128xf32>
    %15 = arith.addf %12, %14 : vector<8x128xf32>
    %c0_12 = arith.constant 0 : index
    %c0_13 = arith.constant 0 : index
    %16 = vector.load %arg6[%c0_12, %c0_13] : memref<8x128xf32, #tpu.memory_space<vmem>>, vector<8x128xf32>
    tpu.vector_store %arg6[%c0_12, %c0_13], %15 {strides = array<i32>} : memref<8x128xf32, #tpu.memory_space<vmem>>, vector<8x128xf32>,
    return
  }
  func.func @transform_0(%arg0: i32) -> (i32, i32) {
    %c0_i32 = arith.constant 0 : i32
    %c0_i32_0 = arith.constant 0 : i32
    return %arg0, %c0_i32 : i32, i32
  }
  func.func @transform_1(%arg0: i32) -> (i32, i32) {
    %c0_i32 = arith.constant 0 : i32
    %c0_i32_0 = arith.constant 0 : i32
    %c0_i32_1 = arith.constant 0 : i32
    return %c0_i32, %c0_i32_0 : i32, i32
  }
  func.func @transform_2(%arg0: i32) -> (i32, i32) {
    %c0_i32 = arith.constant 0 : i32
    %c0_i32_0 = arith.constant 0 : i32
    %c0_i32_1 = arith.constant 0 : i32
    return %c0_i32, %c0_i32_0 : i32, i32
  }
  func.func @transform_3(%arg0: i32) -> (i32, i32) {
    %c0_i32 = arith.constant 0 : i32
    %c0_i32_0 = arith.constant 0 : i32
    %c0_i32_1 = arith.constant 0 : i32
    return %c0_i32, %c0_i32_0 : i32, i32
  }
  func.func @transform_4(%arg0: i32) -> (i32, i32) {
    %c0_i32 = arith.constant 0 : i32
    %c0_i32_0 = arith.constant 0 : i32
    %c0_i32_1 = arith.constant 0 : i32
    return %c0_i32, %c0_i32_0 : i32, i32
  }
  func.func @transform_5(%arg0: i32) -> (i32, i32) {
    %c0_i32 = arith.constant 0 : i32
    %c0_i32_0 = arith.constant 0 : i32
    return %arg0, %c0_i32 : i32, i32
  }
}

</mosaic_0001>

<bundles_post_ra>
// kernel: model_forward.1
= control target key start
LH: loop header
LB: loop body
LE: loop exit
PB: predicated region body
PF: predicated region fallthrough
CT: control target
= control target key end

     0   :  { %10 = vsyncpa [#allocation3], 0  ;;  %s714_s0 = inlined_call_operand.vmem [shape: f32[8,480], index: 0, kind: input, shape index: {}]   ;;  %s715_s1 = inlined_call_operand.hbm [shape: f32[480,128], index: 1, kind: input, shape index: {}]   ;;  %s716_s2 = inlined_call_operand.vmem [shape: f32[1,128], index: 2, kind: input, shape index: {}]   ;;  %s717_s3 = inlined_call_operand.hbm [shape: f32[128,128], index: 3, kind: input, shape index: {}]   ;;  %s718_s4 = inlined_call_operand.vmem [shape: f32[1,128], index: 4, kind: input, shape index: {}]   ;;  %s719_s5 = inlined_call_operand.vmem [shape: f32[8,128], index: 5, kind: output, shape index: {}]  }
   0x1   :  { %11 = vsyncpa [#allocation5], 0  ;;  %s609_s18 = smov [#allocation2]   ;;  %s561_s22 = scalar_lea.hbm %s715_s1, 7680 }
   0x2   :  { %s19_s19 = sshll.u32 %s609_s18, 4  ;;  %p562_p0 = scmp.ne.s32.totalorder %s715_s1, %s561_s22  ;;  %s20_s19 = int_to_ptr.vmem [resolvable:$true] %s19_s19 }
   0x3   :  { %p565_p1 = scmp.lt.u32.totalorder %s561_s22, %s715_s1 }
   0x5   :  { %p567_p2 = pnand %p565_p1, %p562_p0 }
   0x7   :  { %570 = shalt.err (!%p567_p2)
}
   0x8   :  { %s571_s27 = scalar_lea.vmem %s20_s19, 7680  ;;  %p576_p4 = scmp.lt.s32.totalorder %s20_s19, %s20_s19 }
   0x9   :  { %p572_p3 = scmp.ne.s32.totalorder %s20_s19, %s571_s27  ;;  %p577_p5 = scmp.lt.s32.totalorder %s571_s27, %s571_s27 }
   0xb   :  { %p578_p6 = por %p577_p5, %p576_p4 }
   0xd   :  { %p579_p7 = pnand %p578_p6, %p572_p3 }
   0xf   :  { %582 = shalt.err (!%p579_p7)
}
  0x10   :  { %s610_s28 = smov 128   ;;  %s611_s29 = smov 8  }
  0x11   :  { %25 = dma.hbm_to_vmem [thread:$0]  %s715_s1, 7680, %s20_s19, [#allocation3], %s610_s28, %s610_s28, %s611_s29  }
  0x12   :  { %s612_s7 = smov [#allocation4]   ;;  %s583_s11 = scalar_lea.hbm %s717_s3, 2048 }
  0x13   :  { %s33_s8 = sshll.u32 %s612_s7, 4  ;;  %p584_p8 = scmp.ne.s32.totalorder %s717_s3, %s583_s11  ;;  %s34_s8 = int_to_ptr.vmem [resolvable:$true] %s33_s8 }
  0x14   :  { %p587_p9 = scmp.lt.u32.totalorder %s583_s11, %s717_s3 }
  0x16   :  { %p589_p10 = pnand %p587_p9, %p584_p8 }
  0x18   :  { %592 = shalt.err (!%p589_p10)
}
  0x19   :  { %s593_s16 = scalar_lea.vmem %s34_s8, 2048  ;;  %p598_p12 = scmp.lt.s32.totalorder %s34_s8, %s34_s8 }
  0x1a   :  { %p594_p11 = scmp.ne.s32.totalorder %s34_s8, %s593_s16  ;;  %p599_p13 = scmp.lt.s32.totalorder %s593_s16, %s593_s16 }
  0x1c   :  { %p600_p0 = por %p599_p13, %p598_p12 }
  0x1e   :  { %p601_p1 = pnand %p600_p0, %p594_p11 }
  0x20   :  { %604 = shalt.err (!%p601_p1)
}
  0x21   :  { %39 = dma.hbm_to_vmem [thread:$0]  %s717_s3, 2048, %s34_s8, [#allocation5], %s610_s28, %s610_s28, %s611_s29  }
  0x22   :  { %605 = dma.done.wait [#allocation3], 7680  }
  0x23   :  { %606 = vsyncadd [#allocation3], 4294959616 }
  0x24   :  { %607 = dma.done.wait [#allocation5], 2048  }
  0x25   :  { %608 = vsyncadd [#allocation5], 4294965248  ;;  %v613_v0 = vmov 0.0|0.0   ;;  %v84_v1 = vld [vmem:[#allocation2 + $0x100] sm:$0xff]  ;;  %v85_v2 = vld [vmem:[#allocation2 + $0x108] sm:$0xff]  ;;  %vm119_vm0 = vcmask 785408  }
  0x26   :  { %488 = vmatprep.subr.bf16.mxu1 %v613_v0  ;;  %v86_v3 = vld [vmem:[#allocation2 + $0x110] sm:$0xff]  ;;  %v489_v4 = vpack.c.bf16 %v85_v2, %v84_v1  ;;  %v87_v5 = vld [vmem:[#allocation2 + $0x118] sm:$0xff]  ;;  %v88_v7 = vld [vmem:[#allocation2 + $0x120] sm:$0xff]  ;;  %vm614_vm1 = vmmov 0  }
  0x27   :  { %v492_v6 = vpack.c.bf16 %v87_v5, %v86_v3  ;;  %v68_v8 = vld [vmem:[#allocation2 + $0x80] sm:$0xff]  ;;  %v69_v9 = vld [vmem:[#allocation2 + $0x88] sm:$0xff]  ;;  %v70_v15 = vld [vmem:[#allocation2 + $0x90] sm:$0xff] }
  0x28   :  { %490 = vmatpush1.bf16.msra.mxu1 %v489_v4  ;;  %v89_v10 = vld [vmem:[#allocation2 + $0x128] sm:$0xff]  ;;  %v456_v11 = vpack.c.bf16 %v69_v9, %v68_v8  ;;  %v52_v12 = vld [vmem:[#allocation2] sm:$0xff]  ;;  %v71_v16 = vld [vmem:[#allocation2 + $0x98] sm:$0xff] }
  0x29   :  { %491 = vmatprep.subr.bf16.mxu1 %v613_v0  ;;  %v53_v13 = vld [vmem:[#allocation2 + $0x8] sm:$0xff]  ;;  %v460_v17 = vpack.c.bf16 %v71_v16, %v70_v15  ;;  %v54_v18 = vld [vmem:[#allocation2 + $0x10] sm:$0xff]  ;;  %v55_v19 = vld [vmem:[#allocation2 + $0x18] sm:$0xff]  ;;  %v495_v20 = vpack.c.bf16 %v89_v10, %v88_v7 }
  0x2a   :  { %v458_v14 = vpack.c.bf16 %v53_v13, %v52_v12  ;;  %457 = vmatprep.subr.bf16.mxu0 %v456_v11  ;;  %v90_v21 = vld [vmem:[#allocation2 + $0x130] sm:$0xff]  ;;  %v462_v22 = vpack.c.bf16 %v55_v19, %v54_v18  ;;  %v72_v23 = vld [vmem:[#allocation2 + $0xa0] sm:$0xff]  ;;  %v73_v24 = vld [vmem:[#allocation2 + $0xa8] sm:$0xff] }
  0x2b   :  { %v91_v25 = vld [vmem:[#allocation2 + $0x138] sm:$0xff]  ;;  %v464_v26 = vpack.c.bf16 %v73_v24, %v72_v23  ;;  %v56_v27 = vld [vmem:[#allocation2 + $0x20] sm:$0xff]  ;;  %v57_v28 = vld [vmem:[#allocation2 + $0x28] sm:$0xff] }
  0x2c   :  { %493 = vmatpush1.bf16.msra.mxu1 %v492_v6  ;;  %459 = vmatpush3.bf16.msra.mxu0 %v458_v14  ;;  %v74_v29 = vld [vmem:[#allocation2 + $0xb0] sm:$0xff]  ;;  %v75_v30 = vld [vmem:[#allocation2 + $0xb8] sm:$0xff]  ;;  %v498_v31 = vpack.c.bf16 %v91_v25, %v90_v21  ;;  %v92_v32 = vld [vmem:[#allocation2 + $0x140] sm:$0xff]  ;;  %v466_v33 = vpack.c.bf16 %v57_v28, %v56_v27 }
  0x2d   :  { %494 = vmatprep.subr.bf16.mxu1 %v613_v0  ;;  %461 = vmatprep.subr.bf16.mxu0 %v460_v17  ;;  %v93_v34 = vld [vmem:[#allocation2 + $0x148] sm:$0xff]  ;;  %v468_v35 = vpack.c.bf16 %v75_v30, %v74_v29  ;;  %v58_v36 = vld [vmem:[#allocation2 + $0x30] sm:$0xff]  ;;  %v59_v37 = vld [vmem:[#allocation2 + $0x38] sm:$0xff] }
  0x2e   :  { %v76_v38 = vld [vmem:[#allocation2 + $0xc0] sm:$0xff]  ;;  %v77_v39 = vld [vmem:[#allocation2 + $0xc8] sm:$0xff]  ;;  %v501_v40 = vpack.c.bf16 %v93_v34, %v92_v32  ;;  %v94_v41 = vld [vmem:[#allocation2 + $0x150] sm:$0xff]  ;;  %v470_v42 = vpack.c.bf16 %v59_v37, %v58_v36 }
  0x2f   :  { %v95_v43 = vld [vmem:[#allocation2 + $0x158] sm:$0xff]  ;;  %v472_v44 = vpack.c.bf16 %v77_v39, %v76_v38  ;;  %v60_v45 = vld [vmem:[#allocation2 + $0x40] sm:$0xff]  ;;  %v61_v46 = vld [vmem:[#allocation2 + $0x48] sm:$0xff] }
  0x30   :  { %496 = vmatpush1.bf16.msra.mxu1 %v495_v20  ;;  %463 = vmatpush3.bf16.msra.mxu0 %v462_v22  ;;  %v78_v47 = vld [vmem:[#allocation2 + $0xd0] sm:$0xff]  ;;  %v79_v48 = vld [vmem:[#allocation2 + $0xd8] sm:$0xff]  ;;  %v49_v49 = vld [vmem:[%s714_s0 + $0x8] sm:$0xff]  ;;  %v504_v50 = vpack.c.bf16 %v95_v43, %v94_v41  ;;  %v474_v53 = vpack.c.bf16 %v61_v46, %v60_v45 }
  0x31   :  { %497 = vmatprep.subr.bf16.mxu1 %v613_v0  ;;  %465 = vmatprep.subr.bf16.mxu0 %v464_v26  ;;  %v96_v51 = vld [vmem:[#allocation2 + $0x160] sm:$0xff]  ;;  %v97_v52 = vld [vmem:[#allocation2 + $0x168] sm:$0xff]  ;;  %v476_v54 = vpack.c.bf16 %v79_v48, %v78_v47  ;;  %v62_v55 = vld [vmem:[#allocation2 + $0x50] sm:$0xff] }
  0x32   :  { %v63_v56 = vld [vmem:[#allocation2 + $0x58] sm:$0xff]  ;;  %v80_v58 = vld [vmem:[#allocation2 + $0xe0] sm:$0xff]  ;;  %v81_v59 = vld [vmem:[#allocation2 + $0xe8] sm:$0xff]  ;;  %187 = vmatprep.mubr.f32.mxu0 %v49_v49  ;;  %v507_v60 = vpack.c.bf16 %v97_v52, %v96_v51 }
  0x33   :  { %v51_v57 = vld [vmem:[%s714_s0 + $0x18] sm:$0xff]  ;;  %v98_v61 = vld [vmem:[#allocation2 + $0x170] sm:$0xff]  ;;  %v478_v62 = vpack.c.bf16 %v63_v56, %v62_v55  ;;  %v480_v1 = vpack.c.bf16 %v81_v59, %v80_v58  ;;  %v64_v2 = vld [vmem:[#allocation2 + $0x60] sm:$0xff]  ;;  %v615_v56 = vmov 0.0  }
  0x34   :  { %499 = vmatpush1.bf16.msra.mxu1 %v498_v31  ;;  %467 = vmatpush3.bf16.msra.mxu0 %v466_v33  ;;  %v99_v63 = vld [vmem:[#allocation2 + $0x178] sm:$0xff]  ;;  %v65_v3 = vld [vmem:[#allocation2 + $0x68] sm:$0xff]  ;;  %v82_v4 = vld [vmem:[#allocation2 + $0xf0] sm:$0xff] }
  0x35   :  { %500 = vmatprep.subr.bf16.mxu1 %v613_v0  ;;  %469 = vmatprep.subr.bf16.mxu0 %v468_v35  ;;  %v83_v5 = vld [vmem:[#allocation2 + $0xf8] sm:$0xff]  ;;  %v510_v6 = vpack.c.bf16 %v99_v63, %v98_v61  ;;  %v100_v7 = vld [vmem:[#allocation2 + $0x180] sm:$0xff]  ;;  %v482_v8 = vpack.c.bf16 %v65_v3, %v64_v2  ;;  %v101_v9 = vld [vmem:[#allocation2 + $0x188] sm:$0xff] }
  0x36   :  { %367 = vmatprep.mubr.msk.f32.mxu1 %vm119_vm0, %v51_v57  ;;  %v484_v10 = vpack.c.bf16 %v83_v5, %v82_v4  ;;  %v66_v11 = vld [vmem:[#allocation2 + $0x70] sm:$0xff]  ;;  %v67_v12 = vld [vmem:[#allocation2 + $0x78] sm:$0xff]  ;;  %v513_v13 = vpack.c.bf16 %v101_v9, %v100_v7  ;;  %v266_v17 = vld [vmem:[#allocation4] sm:$0xff] }
  0x37   :  { %v102_v14 = vld [vmem:[#allocation2 + $0x190] sm:$0xff]  ;;  %v486_v15 = vpack.c.bf16 %v67_v12, %v66_v11  ;;  %v103_v16 = vld [vmem:[#allocation2 + $0x198] sm:$0xff]  ;;  %v267_v18 = vld [vmem:[#allocation4 + $0x8] sm:$0xff] }
  0x38   :  { %502 = vmatpush1.bf16.msra.mxu1 %v501_v40  ;;  %471 = vmatpush3.bf16.msra.mxu0 %v470_v42  ;;  %v516_v19 = vpack.c.bf16 %v103_v16, %v102_v14  ;;  %v104_v20 = vld [vmem:[#allocation2 + $0x1a0] sm:$0xff]  ;;  %v531_v22 = vpack.c.bf16 %v267_v18, %v266_v17  ;;  %v105_v23 = vld [vmem:[#allocation2 + $0x1a8] sm:$0xff]  ;;  %v268_v24 = vld [vmem:[#allocation4 + $0x10] sm:$0xff] }
  0x39   :  { %503 = vmatprep.subr.bf16.mxu1 %v613_v0  ;;  %473 = vmatprep.subr.bf16.mxu0 %v472_v44  ;;  %v48_v21 = vld [vmem:[%s714_s0] sm:$0xff]  ;;  %v269_v25 = vld [vmem:[#allocation4 + $0x18] sm:$0xff]  ;;  %v519_v26 = vpack.c.bf16 %v105_v23, %v104_v20  ;;  %v106_v27 = vld [vmem:[#allocation2 + $0x1b0] sm:$0xff] }
  0x3a   :  { %v534_v28 = vpack.c.bf16 %v269_v25, %v268_v24  ;;  %v107_v29 = vld [vmem:[#allocation2 + $0x1b8] sm:$0xff]  ;;  %v270_v30 = vld [vmem:[#allocation4 + $0x20] sm:$0xff]  ;;  %v271_v31 = vld [vmem:[#allocation4 + $0x28] sm:$0xff] }
  0x3b   :  { %v522_v32 = vpack.c.bf16 %v107_v29, %v106_v27  ;;  %v108_v33 = vld [vmem:[#allocation2 + $0x1c0] sm:$0xff]  ;;  %v537_v34 = vpack.c.bf16 %v271_v31, %v270_v30  ;;  %v109_v35 = vld [vmem:[#allocation2 + $0x1c8] sm:$0xff]  ;;  %v272_v36 = vld [vmem:[#allocation4 + $0x30] sm:$0xff] }
  0x3c   :  { %505 = vmatpush1.bf16.msra.mxu1 %v504_v50  ;;  %475 = vmatpush3.bf16.msra.mxu0 %v474_v53  ;;  %v273_v37 = vld [vmem:[#allocation4 + $0x38] sm:$0xff]  ;;  %v525_v38 = vpack.c.bf16 %v109_v35, %v108_v33  ;;  %v110_v39 = vld [vmem:[#allocation2 + $0x1d0] sm:$0xff]  ;;  %v274_v42 = vld [vmem:[#allocation4 + $0x40] sm:$0xff] }
  0x3d   :  { %506 = vmatprep.subr.bf16.mxu1 %v613_v0  ;;  %477 = vmatprep.subr.bf16.mxu0 %v476_v54  ;;  %v540_v40 = vpack.c.bf16 %v273_v37, %v272_v36  ;;  %v111_v41 = vld [vmem:[#allocation2 + $0x1d8] sm:$0xff]  ;;  %v275_v43 = vld [vmem:[#allocation4 + $0x48] sm:$0xff]  ;;  %v50_v46 = vld [vmem:[%s714_s0 + $0x10] sm:$0xff] }
  0x3e   :  { %v528_v44 = vpack.c.bf16 %v111_v41, %v110_v39  ;;  %v543_v45 = vpack.c.bf16 %v275_v43, %v274_v42  ;;  %v276_v47 = vld [vmem:[#allocation4 + $0x50] sm:$0xff]  ;;  %v277_v48 = vld [vmem:[#allocation4 + $0x58] sm:$0xff]  ;;  %v278_v49 = vld [vmem:[#allocation4 + $0x60] sm:$0xff] }
  0x3f   :  { %v546_v50 = vpack.c.bf16 %v277_v48, %v276_v47  ;;  %v279_v51 = vld [vmem:[#allocation4 + $0x68] sm:$0xff]  ;;  %v280_v53 = vld [vmem:[#allocation4 + $0x70] sm:$0xff]  ;;  %v281_v54 = vld [vmem:[#allocation4 + $0x78] sm:$0xff] }
  0x40   :  { %508 = vmatpush1.bf16.msra.mxu1 %v507_v60  ;;  %479 = vmatpush3.bf16.msra.mxu0 %v478_v62  ;;  %v549_v52 = vpack.c.bf16 %v279_v51, %v278_v49  ;;  %v552_v55 = vpack.c.bf16 %v281_v54, %v280_v53  ;;  %v366_v60 = vld [vmem:[%s716_s2] ss:$0 sm:$0xff] }
  0x41   :  { %509 = vmatprep.subr.bf16.mxu1 %v613_v0  ;;  %481 = vmatprep.subr.bf16.mxu0 %v480_v1  ;;  %v368_v3 = vld [vmem:[%s718_s4] ss:$0 sm:$0xff] }
  0x44   :  { %511 = vmatpush1.bf16.msra.mxu1 %v510_v6  ;;  %483 = vmatpush3.bf16.msra.mxu0 %v482_v8 }
  0x45   :  { %512 = vmatprep.subr.bf16.mxu1 %v613_v0  ;;  %485 = vmatprep.subr.bf16.mxu0 %v484_v10 }
  0x48   :  { %514 = vmatpush1.bf16.msra.mxu1 %v513_v13  ;;  %487 = vmatpush3.bf16.msra.mxu0 %v486_v15 }
  0x49   :  { %515 = vmatprep.subr.bf16.mxu1 %v613_v0  ;;  %530 = vmatprep.subr.bf16.mxu0 %v613_v0 }
  0x4b   :  { %188 = vmatmul.mubr.f32.vlgmr.msra.gmra.mrb[0].mxu0 %v48_v21 }
  0x4c   :  { %517 = vmatpush1.bf16.msra.mxu1 %v516_v19  ;;  %532 = vmatpush3.bf16.msra.mxu0 %v531_v22 }
  0x4d   :  { %518 = vmatprep.subr.bf16.mxu1 %v613_v0  ;;  %533 = vmatprep.subr.bf16.mxu0 %v613_v0 }
  0x4e   :  { %453 = vmatprep.mubr.msk.f32.mxu0 %vm614_vm1, %v615_v56 }
  0x50   :  { %520 = vmatpush1.bf16.msra.mxu1 %v519_v26  ;;  %535 = vmatpush3.bf16.msra.mxu0 %v534_v28 }
  0x51   :  { %521 = vmatprep.subr.bf16.mxu1 %v613_v0  ;;  %536 = vmatprep.subr.bf16.mxu0 %v613_v0 }
  0x54   :  { %523 = vmatpush1.bf16.msra.mxu1 %v522_v32  ;;  %538 = vmatpush3.bf16.msra.mxu0 %v537_v34 }
  0x55   :  { %524 = vmatprep.subr.bf16.mxu1 %v613_v0  ;;  %539 = vmatprep.subr.bf16.mxu0 %v613_v0 }
  0x58   :  { %526 = vmatpush1.bf16.msra.mxu1 %v525_v38  ;;  %541 = vmatpush3.bf16.msra.mxu0 %v540_v40 }
  0x59   :  { %527 = vmatprep.subr.bf16.mxu1 %v613_v0  ;;  %542 = vmatprep.subr.bf16.mxu0 %v613_v0 }
  0x5c   :  { %529 = vmatpush1.bf16.msra.mxu1 %v528_v44  ;;  %544 = vmatpush3.bf16.msra.mxu0 %v543_v45 }
  0x5d   :  { %545 = vmatprep.subr.bf16.mxu0 %v613_v0 }
  0x5f   :  { %258 = vmatmul.mubr.f32.vlgmr.msra.gmra.mrb[0].mxu1 %v50_v46 }
  0x60   :  { %547 = vmatpush3.bf16.msra.mxu0 %v546_v50 }
  0x61   :  { %548 = vmatprep.subr.bf16.mxu0 %v613_v0 }
  0x64   :  { %550 = vmatpush3.bf16.msra.mxu0 %v549_v52 }
  0x65   :  { %551 = vmatprep.subr.bf16.mxu0 %v613_v0 }
  0x68   :  { %553 = vmatpush3.bf16.msra.mxu0 %v552_v55 }
 0x11e   :  { %v401_v57 = vpop.f32.mrb[0].mxu0 }
 0x11f   :  { %v402_v58 = vpop.f32.mrb[1].mxu0 }
 0x120   :  { %v403_v59 = vadd.f32 %v402_v58, %v401_v57 }
 0x122   :  { %v190_v61 = vadd.f32 %v403_v59, %v366_v60 }
 0x132   :  { %v259_v62 = vpop.f32.mrb[0].mxu1 }
 0x133   :  { %v260_v63 = vadd.f32 %v259_v62, %v190_v61  ;;  %v261_v1 = vpop.f32.mrb[1].mxu1 }
 0x135   :  { %vm263_vm2 = vcmp.gt.f32.partialorder %v260_v63, 0.0  ;;  %v264_v0 = vmul.f32 0.5, %v260_v63 }
 0x137   :  { %v265_v2 = vsel %vm263_vm2, %v260_v63, %v264_v0 }
 0x138   :  { %454 = vmatmul.mubr.f32.vlgmr.msra.gmra.mrb[2].mxu0 %v265_v2 }
 0x20b   :  { %v355_v4 = vpop.f32.mrb[2].mxu0 }
 0x20c   :  { %v356_v5 = vadd.f32 %v368_v3, %v355_v4  ;;  %v455_v6 = vpop.f32.mrb[3].mxu0 }
 0x20e   :  { %359 = vst [vmem:[%s719_s5] sm:$0xff] %v356_v5 }
 0x20f   :  { %364 = vsyncpa [#allocation3], 1 }
 0x210   :  { %365 = vsyncpa [#allocation5], 1 }

</bundles_post_ra>
